<compile_context>
chip_gen: v7x
topology: tpu7x:2x2x1
jax: 0.10.0
libtpu: 0.0.40
codegen_flags: <defaults>
</compile_context>

<pallas_src>
import functools

import jax
import jax.numpy as jnp
from jax.experimental import pallas as pl
from jax.experimental.pallas import tpu as pltpu


def _round_up(x, m):
    return (x + m - 1) // m * m


def _tpu_generation():
    try:
        kind = jax.devices()[0].device_kind.lower()
    except Exception:
        return "unknown"
    if "v7" in kind or "7x" in kind:
        return "v7x"
    if "v6" in kind:
        return "v6e"
    if "v5" in kind:
        return "v5e"
    return "unknown"


# Per-generation tuning (review items: VMEM limit, vocab tile, MXU-shaped batch tile,
# bf16 counts only where the VPU is bf16-capable).
_GEN_CONFIG = {
    "v5e":     dict(vmem_limit=100 * 2**20, v_tile_max=8192, b_tile_max=128, counts_bf16=False),
    "v6e":     dict(vmem_limit=100 * 2**20, v_tile_max=8192, b_tile_max=256, counts_bf16=True),
    "v7x":     dict(vmem_limit=48 * 2**20,  v_tile_max=4096, b_tile_max=256, counts_bf16=True),
    "unknown": dict(vmem_limit=None,        v_tile_max=2048, b_tile_max=128, counts_bf16=False),
}


# ----------------------------------------------------------------------------------
# Shared MLP head (fc1/tanh -> fc2/tanh -> fc3 -> softmax|sigmoid) on a pooled block.
# ----------------------------------------------------------------------------------
def _mlp_head(pooled, w1_ref, b1_ref, w2_ref, b2_ref, w3_ref, b3_ref,
              *, num_classes, last_activation):
    h = jnp.tanh(jnp.dot(pooled, w1_ref[...],
                         preferred_element_type=jnp.float32) + b1_ref[...])
    h = jnp.tanh(jnp.dot(h, w2_ref[...],
                         preferred_element_type=jnp.float32) + b2_ref[...])
    logits = jnp.dot(h, w3_ref[...],
                     preferred_element_type=jnp.float32) + b3_ref[...]      # (b_tile, O_pad)
    if last_activation == "softmax":
        # mask the zero-padded classes of the lane-dense output before the softmax
        lane = jax.lax.broadcasted_iota(jnp.int32, logits.shape, 1)
        logits = jnp.where(lane < num_classes, logits, jnp.float32(-1e30))
        m = jnp.max(logits, axis=1, keepdims=True)
        e = jnp.exp(logits - m)
        denom = jnp.sum(e, axis=1, keepdims=True)
        return e * pl.reciprocal(denom, approx=True)
    elif last_activation == "sigmoid":
        return 1.0 / (1.0 + jnp.exp(-logits))
    else:
        raise ValueError(f"unsupported activation_last_layer: {last_activation}")


# ----------------------------------------------------------------------------------
# Path A: bag-of-words (small vocab).  counts(ids) @ emb_table, vocab axis tiled.
# ----------------------------------------------------------------------------------
def _bow_kernel(ids_ref, emb_ref, w1_ref, b1_ref, w2_ref, b2_ref, w3_ref, b3_ref,
                out_ref, pooled_ref,
                *, seq_len, num_classes, vocab_tile, counts_dtype, last_activation):
    k = pl.program_id(1)                       # vocab (reduction) axis -> "arbitrary"
    nk = pl.num_programs(1)

    @pl.when(k == 0)
    def _init():
        pooled_ref[...] = jnp.zeros_like(pooled_ref)

    b_tile = ids_ref.shape[0]
    ids = ids_ref[...]                                                    # (b_tile, S)
    col = jax.lax.broadcasted_iota(jnp.int32, (b_tile, vocab_tile), 1) + k * vocab_tile

    counts0 = jnp.zeros((b_tile, vocab_tile), counts_dtype)
    if seq_len <= 32:
        counts = counts0
        for s in range(seq_len):               # small static S: unrolled compare+add
            counts = counts + (col == ids[:, s:s + 1]).astype(counts_dtype)
    else:
        def body(s, c):                        # long S: keep LLO visibility, no blow-up
            tok = jax.lax.dynamic_slice_in_dim(ids, s, 1, axis=1)         # (b_tile, 1)
            return c + (col == tok).astype(counts_dtype)
        counts = jax.lax.fori_loop(0, seq_len, body, counts0, unroll=8)

    # MXU: counts @ emb_tile, bf16 operands where exact, f32 accumulation
    emb = emb_ref[...]
    if counts_dtype == jnp.bfloat16:
        lhs = counts                                       # already bf16 (v6e/v7x)
    elif seq_len <= 256:
        lhs = counts.astype(jnp.bfloat16)                  # counts <= 256 exact in bf16
    else:
        lhs = counts                                       # long sequences: stay f32
        emb = emb.astype(jnp.float32)
    pooled_ref[...] += jnp.dot(lhs, emb, preferred_element_type=jnp.float32)

    @pl.when(k == nk - 1)
    def _finalize():
        pooled = pooled_ref[...] * (1.0 / seq_len)         # AdaptiveAvgPool1d(1) mean
        out_ref[...] = _mlp_head(pooled, w1_ref, b1_ref, w2_ref, b2_ref, w3_ref, b3_ref,
                                 num_classes=num_classes, last_activation=last_activation)


# ----------------------------------------------------------------------------------
# Path B: DMA row-gather (large vocab).  ids are scalar-prefetched into SMEM; the
# embedding table stays in HBM and only the B*S referenced rows are DMA'd.
# ----------------------------------------------------------------------------------
def _gather_kernel(ids_ref,        # SMEM (B_pad*S,) int32   [scalar prefetch]
                   emb_hbm,        # HBM  (V_pad, E) bf16    [memory_space=pl.ANY]
                   w1_ref, b1_ref, w2_ref, b2_ref, w3_ref, b3_ref,
                   out_ref,        # VMEM (b_tile, O_pad) f32
                   rows_ref,       # VMEM (S*b_tile, E) bf16 scratch (gathered rows)
                   sem,            # DMA semaphores (window,)
                   *, seq_len, b_tile, emb_dim, vocab_size,
                   num_classes, last_activation, window):
    b = pl.program_id(0)
    n_tok = b_tile * seq_len
    base = b * n_tok

    def make_copy(t, slot):
        # Clamp defensively: out-of-range ids read the last valid row instead of
        # faulting (the BOW path maps them to a zero vector; torch would raise).
        tok = jnp.clip(ids_ref[base + t], 0, vocab_size - 1)
        r = t // seq_len
        s = t - r * seq_len
        dst = s * b_tile + r                   # layout (s, r): keeps sublanes aligned
        return pltpu.make_async_copy(emb_hbm.at[pl.ds(tok, 1), :],
                                     rows_ref.at[pl.ds(dst, 1), :],
                                     sem.at[slot])

    def wait_slot(slot):
        pltpu.make_async_copy(emb_hbm.at[pl.ds(0, 1), :],
                              rows_ref.at[pl.ds(0, 1), :],
                              sem.at[slot]).wait()

    # prime a small window of in-flight row DMAs
    nw = min(window, n_tok)
    for t in range(nw):
        make_copy(t, t % window).start()

    @pl.loop(0, n_tok)
    def _(t):
        slot = t % window
        wait_slot(slot)
        @pl.when(t + window < n_tok)
        def _():
            make_copy(t + window, slot).start()

    # mean over the sequence: row for (r, s) sits at s*b_tile + r, so position s is the
    # contiguous (b_tile, E) slab starting at s*b_tile.
    if seq_len <= 32:
        pooled = jnp.zeros((b_tile, emb_dim), jnp.float32)
        for s in range(seq_len):
            pooled = pooled + rows_ref[pl.ds(s * b_tile, b_tile), :].astype(jnp.float32)
    else:
        def seq_body(s, acc):
            off = pl.multiple_of(s * b_tile, 8)
            return acc + rows_ref[pl.ds(off, b_tile), :].astype(jnp.float32)
        pooled = jax.lax.fori_loop(0, seq_len, seq_body,
                                   jnp.zeros((b_tile, emb_dim), jnp.float32), unroll=8)
    pooled = pooled * (1.0 / seq_len)

    out_ref[...] = _mlp_head(pooled, w1_ref, b1_ref, w2_ref, b2_ref, w3_ref, b3_ref,
                             num_classes=num_classes, last_activation=last_activation)


# ----------------------------------------------------------------------------------
# One-time parameter preparation (hoists the per-call pad + bf16 cast out of forward).
# ----------------------------------------------------------------------------------
def prepare_text_classifier_params(emb_table, w1, b1, w2, b2, w3, b3, *, generation=None):
    gen = generation or _tpu_generation()
    cfg = dict(_GEN_CONFIG.get(gen, _GEN_CONFIG["unknown"]))

    V, E = emb_table.shape
    H = w1.shape[1]
    O = w3.shape[1]
    O_pad = _round_up(max(O, 128), 128)        # lane-dense output block

    # vocab tile for the BOW path, shrunk to fit a conservative VMEM budget
    v_tile = cfg["v_tile_max"]
    budget = 0.6 * (cfg["vmem_limit"] or 32 * 2**20)
    counts_bytes = 2 if cfg["counts_bf16"] else 4
    while v_tile > 512:
        need = (2 * v_tile * E * 2                      # emb double buffer (bf16)
                + cfg["b_tile_max"] * v_tile * counts_bytes   # counts temporary
                + cfg["b_tile_max"] * E * 4)            # pooled accumulator
        if need <= budget:
            break
        v_tile //= 2
    if V <= v_tile:
        v_tile = max(16, _round_up(V, 16))             # single tile, bf16-friendly pad
    V_pad = _round_up(V, v_tile)

    emb_p = jnp.zeros((V_pad, E), jnp.bfloat16).at[:V].set(emb_table.astype(jnp.bfloat16))
    w3_p = jnp.zeros((H, O_pad), jnp.float32).at[:, :O].set(w3.astype(jnp.float32))
    b3_p = jnp.zeros((1, O_pad), jnp.float32).at[:, :O].set(b3.astype(jnp.float32))

    return dict(
        generation=gen, cfg=cfg,
        V=V, E=E, H=H, O=O, O_pad=O_pad, v_tile=v_tile, V_pad=V_pad,
        emb=emb_p,
        w1=jnp.asarray(w1, jnp.float32), b1=jnp.asarray(b1, jnp.float32).reshape(1, H),
        w2=jnp.asarray(w2, jnp.float32), b2=jnp.asarray(b2, jnp.float32).reshape(1, H),
        w3=w3_p, b3=b3_p,
    )


# ----------------------------------------------------------------------------------
# Forward pass.
# ----------------------------------------------------------------------------------
def text_classifier_forward(ids, params, *, last_activation="softmax", path="auto",
                            emb_multi_buffer=2):
    B, S = ids.shape
    gen = params["generation"]
    cfg = params["cfg"]
    V, E, H, O = params["V"], params["E"], params["H"], params["O"]
    O_pad, v_tile, V_pad = params["O_pad"], params["v_tile"], params["V_pad"]

    B_pad0 = _round_up(B, 8)

    if path == "auto":
        # gather wins when the table is much larger than the rows actually referenced,
        # and the flattened ids fit comfortably in SMEM
        ids_smem_ok = 4 * B_pad0 * S <= 128 * 1024
        path = "gather" if (ids_smem_ok and V >= 4 * B_pad0 * S) else "bow"

    # batch tiling
    b_tile = min(cfg["b_tile_max"], B_pad0)
    if gen == "v7x" and B_pad0 >= 16 and B_pad0 // b_tile < 2:
        b_tile = max(8, _round_up(B_pad0 // 2, 8))     # >= 2 tiles so both TCs get work
    if path == "gather":
        while b_tile > 8 and S * b_tile * E * 2 > 8 * 2**20:   # cap the gather scratch
            b_tile = max(8, (b_tile // 2 + 7) // 8 * 8)
    B_pad = _round_up(B_pad0, b_tile)
    nb = B_pad // b_tile

    ids_p = jnp.zeros((B_pad, S), jnp.int32).at[:B].set(ids.astype(jnp.int32))
    vmem_limit = cfg["vmem_limit"]

    if path == "bow":
        nk = V_pad // v_tile
        counts_bf16 = cfg["counts_bf16"] and S <= 256          # exact counts in bf16
        kernel = functools.partial(
            _bow_kernel, seq_len=S, num_classes=O, vocab_tile=v_tile,
            counts_dtype=jnp.bfloat16 if counts_bf16 else jnp.float32,
            last_activation=last_activation)

        emb_spec_kwargs = {}
        if emb_multi_buffer > 2 and nk > 2:                    # optional triple-buffering
            emb_spec_kwargs["pipeline_mode"] = pl.Buffered(emb_multi_buffer)
        emb_spec = pl.BlockSpec((v_tile, E), lambda b, k: (k, 0), **emb_spec_kwargs)

        out = pl.pallas_call(
            kernel,
            out_shape=jax.ShapeDtypeStruct((B_pad, O_pad), jnp.float32),
            grid_spec=pltpu.PrefetchScalarGridSpec(
                num_scalar_prefetch=0,
                grid=(nb, nk),                                 # (batch, vocab-reduction)
                in_specs=[
                    pl.BlockSpec((b_tile, S), lambda b, k: (b, 0)),   # ids
                    emb_spec,                                         # emb tile
                    pl.BlockSpec((E, H), lambda b, k: (0, 0)),        # w1
                    pl.BlockSpec((1, H), lambda b, k: (0, 0)),        # b1
                    pl.BlockSpec((H, H), lambda b, k: (0, 0)),        # w2
                    pl.BlockSpec((1, H), lambda b, k: (0, 0)),        # b2
                    pl.BlockSpec((H, O_pad), lambda b, k: (0, 0)),    # w3 (padded)
                    pl.BlockSpec((1, O_pad), lambda b, k: (0, 0)),    # b3 (padded)
                ],
                out_specs=pl.BlockSpec((b_tile, O_pad), lambda b, k: (b, 0)),
                scratch_shapes=[pltpu.VMEM((b_tile, E), jnp.float32)],   # pooled acc
            ),
            compiler_params=pltpu.CompilerParams(
                dimension_semantics=("parallel", "arbitrary"),
                vmem_limit_bytes=vmem_limit,
            ),
        )(ids_p, params["emb"], params["w1"], params["b1"],
          params["w2"], params["b2"], params["w3"], params["b3"])

    else:  # gather path
        window = min(8, b_tile * S)
        kernel = functools.partial(
            _gather_kernel, seq_len=S, b_tile=b_tile, emb_dim=E, vocab_size=V,
            num_classes=O, last_activation=last_activation, window=window)
        ids_flat = ids_p.reshape(-1)

        out = pl.pallas_call(
            kernel,
            out_shape=jax.ShapeDtypeStruct((B_pad, O_pad), jnp.float32),
            grid_spec=pltpu.PrefetchScalarGridSpec(
                num_scalar_prefetch=1,                         # ids -> SMEM
                grid=(nb,),
                in_specs=[
                    pl.BlockSpec(memory_space=pl.ANY),                   # emb (HBM)
                    pl.BlockSpec((E, H), lambda b, ids: (0, 0)),         # w1
                    pl.BlockSpec((1, H), lambda b, ids: (0, 0)),         # b1
                    pl.BlockSpec((H, H), lambda b, ids: (0, 0)),         # w2
                    pl.BlockSpec((1, H), lambda b, ids: (0, 0)),         # b2
                    pl.BlockSpec((H, O_pad), lambda b, ids: (0, 0)),     # w3 (padded)
                    pl.BlockSpec((1, O_pad), lambda b, ids: (0, 0)),     # b3 (padded)
                ],
                out_specs=pl.BlockSpec((b_tile, O_pad), lambda b, ids: (b, 0)),
                scratch_shapes=[
                    pltpu.VMEM((S * b_tile, E), jnp.bfloat16),           # gathered rows
                    pltpu.SemaphoreType.DMA((window,)),
                ],
            ),
            compiler_params=pltpu.CompilerParams(
                dimension_semantics=("parallel",),
                vmem_limit_bytes=vmem_limit,
            ),
        )(ids_flat, params["emb"], params["w1"], params["b1"],
          params["w2"], params["b2"], params["w3"], params["b3"])

    return out[:B, :O]


def reference_forward(ids, emb_table, w1, b1, w2, b2, w3, b3, last_activation="softmax"):
    # pure-JAX reference matching the PyTorch forward
    emb = jnp.take(emb_table, ids, axis=0)          # (B, S, E)
    pooled = jnp.mean(emb, axis=1)                  # AdaptiveAvgPool1d(1) over seq
    h = jnp.tanh(pooled @ w1 + b1)
    h = jnp.tanh(h @ w2 + b2)
    logits = h @ w3 + b3
    if last_activation == "softmax":
        return jax.nn.softmax(logits, axis=1)
    return jax.nn.sigmoid(logits)


if __name__ == "__main__":
    # small shapes consistent with the module
    vocab_size, embed_dim, hidden_dim, output_dim = 64, 32, 32, 8
    pad_idx = 0
    batch, seq = 2, 8

    key = jax.random.PRNGKey(0)
    k_ids, k_emb, k1, k2, k3, kb1, kb2, kb3 = jax.random.split(key, 8)

    ids = jax.random.randint(k_ids, (batch, seq), 0, vocab_size, dtype=jnp.int32)

    emb_table = 0.1 * jax.random.normal(k_emb, (vocab_size, embed_dim), jnp.float32)
    emb_table = emb_table.at[pad_idx].set(0.0)      # padding_idx row is zero

    w1 = 0.1 * jax.random.normal(k1, (embed_dim, hidden_dim), jnp.float32)
    b1 = 0.1 * jax.random.normal(kb1, (1, hidden_dim), jnp.float32)
    w2 = 0.1 * jax.random.normal(k2, (hidden_dim, hidden_dim), jnp.float32)
    b2 = 0.1 * jax.random.normal(kb2, (1, hidden_dim), jnp.float32)
    w3 = 0.1 * jax.random.normal(k3, (hidden_dim, output_dim), jnp.float32)
    b3 = 0.1 * jax.random.normal(kb3, (1, output_dim), jnp.float32)

    # one-time pad + bf16 cast (hoisted out of the forward path)
    params = prepare_text_classifier_params(emb_table, w1, b1, w2, b2, w3, b3)

    ref = reference_forward(ids, emb_table, w1, b1, w2, b2, w3, b3, "softmax")

    # Tolerance accounts for the bf16-quantized embedding table and the approximate
    # (EUP) reciprocal in the softmax denominator; argmax must match exactly.
    for p in ("bow", "gather"):
        out = text_classifier_forward(ids, params, last_activation="softmax", path=p)
        out = jax.block_until_ready(out)
        assert out.shape == (batch, output_dim)
        assert jnp.allclose(out, ref, atol=1e-2, rtol=1e-2), f"{p}: mismatch vs reference"
        assert jnp.array_equal(jnp.argmax(out, 1), jnp.argmax(ref, 1)), f"{p}: argmax mismatch"

    # sigmoid head (BOW path)
    ref_sig = reference_forward(ids, emb_table, w1, b1, w2, b2, w3, b3, "sigmoid")
    out_sig = text_classifier_forward(ids, params, last_activation="sigmoid", path="bow")
    out_sig = jax.block_until_ready(out_sig)
    assert jnp.allclose(out_sig, ref_sig, atol=1e-2, rtol=1e-2), "sigmoid: mismatch"

    print("KERNEL_OK")
</pallas_src>

<mosaic_0001>
module attributes {stable_mosaic.version = 11 : i64} {
  func.func @_bow_kernel(%arg0: i32, %arg1: i32, %arg2: memref<8x8xi32, #tpu.memory_space<vmem>>, %arg3: memref<64x32xbf16, #tpu.memory_space<vmem>>, %arg4: memref<32x32xf32, #tpu.memory_space<vmem>>, %arg5: memref<1x32xf32, #tpu.memory_space<vmem>>, %arg6: memref<32x32xf32, #tpu.memory_space<vmem>>, %arg7: memref<1x32xf32, #tpu.memory_space<vmem>>, %arg8: memref<32x128xf32, #tpu.memory_space<vmem>>, %arg9: memref<1x128xf32, #tpu.memory_space<vmem>>, %arg10: memref<8x128xf32, #tpu.memory_space<vmem>>, %arg11: memref<8x32xf32, #tpu.memory_space<vmem>>) attributes {dimension_semantics = [#tpu.dimension_semantics<parallel>, #tpu.dimension_semantics<arbitrary>], iteration_bounds = array<i64: 1, 1>, scalar_prefetch = 0 : i64, scratch_operands = 1 : i64, tpu.core_type = #tpu.core_type<tc>, window_params = [{transform_indices = @transform_0, window_bounds = array<i64: 8, 8>}, {transform_indices = @transform_1, window_bounds = array<i64: 64, 32>}, {pipeline_mode = #tpu.pipeline_mode<synchronous>, transform_indices = @transform_2, window_bounds = array<i64: 32, 32>}, {pipeline_mode = #tpu.pipeline_mode<synchronous>, transform_indices = @transform_3, window_bounds = array<i64: 1, 32>}, {pipeline_mode = #tpu.pipeline_mode<synchronous>, transform_indices = @transform_4, window_bounds = array<i64: 32, 32>}, {pipeline_mode = #tpu.pipeline_mode<synchronous>, transform_indices = @transform_5, window_bounds = array<i64: 1, 32>}, {pipeline_mode = #tpu.pipeline_mode<synchronous>, transform_indices = @transform_6, window_bounds = array<i64: 32, 128>}, {pipeline_mode = #tpu.pipeline_mode<synchronous>, transform_indices = @transform_7, window_bounds = array<i64: 1, 128>}, {transform_indices = @transform_8, window_bounds = array<i64: 8, 128>}]} {
    %c0_i32 = arith.constant 0 : i32
    %0 = arith.cmpi eq, %arg1, %c0_i32 : i32
    %1 = arith.extui %0 : i1 to i32
    %c0_i32_0 = arith.constant 0 : i32
    %2 = arith.cmpi ne, %1, %c0_i32_0 : i32
    scf.if %2 {
      %cst_11 = arith.constant 0.000000e+00 : f32
      %66 = vector.broadcast %cst_11 : f32 to vector<8x32xf32>
      %c0_12 = arith.constant 0 : index
      %c0_13 = arith.constant 0 : index
      %67 = vector.load %arg11[%c0_12, %c0_13] : memref<8x32xf32, #tpu.memory_space<vmem>>, vector<8x32xf32>
      tpu.vector_store %arg11[%c0_12, %c0_13], %66 {strides = array<i32>} : memref<8x32xf32, #tpu.memory_space<vmem>>, vector<8x32xf32>,
    } else {
    }
    %c0 = arith.constant 0 : index
    %c0_1 = arith.constant 0 : index
    %3 = vector.load %arg2[%c0, %c0_1] : memref<8x8xi32, #tpu.memory_space<vmem>>, vector<8x8xi32>
    %4 = tpu.iota {dimensions = array<i32: 1>} : vector<8x64xi32>
    %c64_i32 = arith.constant 64 : i32
    %5 = arith.muli %arg1, %c64_i32 : i32
    %6 = vector.broadcast %5 : i32 to vector<8x64xi32>
    %7 = arith.addi %4, %6 : vector<8x64xi32>
    %cst = arith.constant 0.000000e+00 : f32
    %8 = vector.broadcast %cst : f32 to vector<8x64xf32>
    %9 = vector.extract_strided_slice %3 {offsets = [0, 0], sizes = [8, 1], strides = [1, 1]} : vector<8x8xi32> to vector<8x1xi32>
    %10 = vector.broadcast %9 : vector<8x1xi32> to vector<8x64xi32>
    %11 = arith.cmpi eq, %7, %10 : vector<8x64xi32>
    %12 = arith.extui %11 : vector<8x64xi1> to vector<8x64xi32>
    %13 = arith.sitofp %12 : vector<8x64xi32> to vector<8x64xf32>
    %14 = arith.addf %8, %13 : vector<8x64xf32>
    %15 = vector.extract_strided_slice %3 {offsets = [0, 1], sizes = [8, 1], strides = [1, 1]} : vector<8x8xi32> to vector<8x1xi32>
    %16 = vector.broadcast %15 : vector<8x1xi32> to vector<8x64xi32>
    %17 = arith.cmpi eq, %7, %16 : vector<8x64xi32>
    %18 = arith.extui %17 : vector<8x64xi1> to vector<8x64xi32>
    %19 = arith.sitofp %18 : vector<8x64xi32> to vector<8x64xf32>
    %20 = arith.addf %14, %19 : vector<8x64xf32>
    %21 = vector.extract_strided_slice %3 {offsets = [0, 2], sizes = [8, 1], strides = [1, 1]} : vector<8x8xi32> to vector<8x1xi32>
    %22 = vector.broadcast %21 : vector<8x1xi32> to vector<8x64xi32>
    %23 = arith.cmpi eq, %7, %22 : vector<8x64xi32>
    %24 = arith.extui %23 : vector<8x64xi1> to vector<8x64xi32>
    %25 = arith.sitofp %24 : vector<8x64xi32> to vector<8x64xf32>
    %26 = arith.addf %20, %25 : vector<8x64xf32>
    %27 = vector.extract_strided_slice %3 {offsets = [0, 3], sizes = [8, 1], strides = [1, 1]} : vector<8x8xi32> to vector<8x1xi32>
    %28 = vector.broadcast %27 : vector<8x1xi32> to vector<8x64xi32>
    %29 = arith.cmpi eq, %7, %28 : vector<8x64xi32>
    %30 = arith.extui %29 : vector<8x64xi1> to vector<8x64xi32>
    %31 = arith.sitofp %30 : vector<8x64xi32> to vector<8x64xf32>
    %32 = arith.addf %26, %31 : vector<8x64xf32>
    %33 = vector.extract_strided_slice %3 {offsets = [0, 4], sizes = [8, 1], strides = [1, 1]} : vector<8x8xi32> to vector<8x1xi32>
    %34 = vector.broadcast %33 : vector<8x1xi32> to vector<8x64xi32>
    %35 = arith.cmpi eq, %7, %34 : vector<8x64xi32>
    %36 = arith.extui %35 : vector<8x64xi1> to vector<8x64xi32>
    %37 = arith.sitofp %36 : vector<8x64xi32> to vector<8x64xf32>
    %38 = arith.addf %32, %37 : vector<8x64xf32>
    %39 = vector.extract_strided_slice %3 {offsets = [0, 5], sizes = [8, 1], strides = [1, 1]} : vector<8x8xi32> to vector<8x1xi32>
    %40 = vector.broadcast %39 : vector<8x1xi32> to vector<8x64xi32>
    %41 = arith.cmpi eq, %7, %40 : vector<8x64xi32>
    %42 = arith.extui %41 : vector<8x64xi1> to vector<8x64xi32>
    %43 = arith.sitofp %42 : vector<8x64xi32> to vector<8x64xf32>
    %44 = arith.addf %38, %43 : vector<8x64xf32>
    %45 = vector.extract_strided_slice %3 {offsets = [0, 6], sizes = [8, 1], strides = [1, 1]} : vector<8x8xi32> to vector<8x1xi32>
    %46 = vector.broadcast %45 : vector<8x1xi32> to vector<8x64xi32>
    %47 = arith.cmpi eq, %7, %46 : vector<8x64xi32>
    %48 = arith.extui %47 : vector<8x64xi1> to vector<8x64xi32>
    %49 = arith.sitofp %48 : vector<8x64xi32> to vector<8x64xf32>
    %50 = arith.addf %44, %49 : vector<8x64xf32>
    %51 = vector.extract_strided_slice %3 {offsets = [0, 7], sizes = [8, 1], strides = [1, 1]} : vector<8x8xi32> to vector<8x1xi32>
    %52 = vector.broadcast %51 : vector<8x1xi32> to vector<8x64xi32>
    %53 = arith.cmpi eq, %7, %52 : vector<8x64xi32>
    %54 = arith.extui %53 : vector<8x64xi1> to vector<8x64xi32>
    %55 = arith.sitofp %54 : vector<8x64xi32> to vector<8x64xf32>
    %56 = arith.addf %50, %55 : vector<8x64xf32>
    %c0_2 = arith.constant 0 : index
    %c0_3 = arith.constant 0 : index
    %57 = vector.load %arg3[%c0_2, %c0_3] : memref<64x32xbf16, #tpu.memory_space<vmem>>, vector<64x32xbf16>
    %58 = arith.truncf %56 : vector<8x64xf32> to vector<8x64xbf16>
    %c0_4 = arith.constant 0 : index
    %c0_5 = arith.constant 0 : index
    %59 = vector.load %arg11[%c0_4, %c0_5] : memref<8x32xf32, #tpu.memory_space<vmem>>, vector<8x32xf32>
    %cst_6 = arith.constant dense<0.000000e+00> : vector<8x32xf32>
    %60 = tpu.matmul %58, %57, %cst_6 {dimension_numbers = #tpu.dot_dimension_numbers<[1], [0], [0], [1], [0, 0, 1, 1], [], []>} : vector<8x64xbf16>, vector<64x32xbf16>, vector<8x32xf32> -> vector<8x32xf32>
    %61 = arith.addf %59, %60 : vector<8x32xf32>
    %c0_7 = arith.constant 0 : index
    %c0_8 = arith.constant 0 : index
    %62 = vector.load %arg11[%c0_7, %c0_8] : memref<8x32xf32, #tpu.memory_space<vmem>>, vector<8x32xf32>
    tpu.vector_store %arg11[%c0_7, %c0_8], %61 {strides = array<i32>} : memref<8x32xf32, #tpu.memory_space<vmem>>, vector<8x32xf32>,
    %c0_i32_9 = arith.constant 0 : i32
    %63 = arith.cmpi eq, %arg1, %c0_i32_9 : i32
    %64 = arith.extui %63 : i1 to i32
    %c0_i32_10 = arith.constant 0 : i32
    %65 = arith.cmpi ne, %64, %c0_i32_10 : i32
    scf.if %65 {
      %c0_11 = arith.constant 0 : index
      %c0_12 = arith.constant 0 : index
      %66 = vector.load %arg11[%c0_11, %c0_12] : memref<8x32xf32, #tpu.memory_space<vmem>>, vector<8x32xf32>
      %cst_13 = arith.constant 1.250000e-01 : f32
      %67 = vector.broadcast %cst_13 : f32 to vector<8x32xf32>
      %68 = arith.mulf %66, %67 : vector<8x32xf32>
      %c0_14 = arith.constant 0 : index
      %c0_15 = arith.constant 0 : index
      %69 = vector.load %arg4[%c0_14, %c0_15] : memref<32x32xf32, #tpu.memory_space<vmem>>, vector<32x32xf32>
      %cst_16 = arith.constant dense<0.000000e+00> : vector<8x32xf32>
      %70 = tpu.matmul %68, %69, %cst_16 {dimension_numbers = #tpu.dot_dimension_numbers<[1], [0], [0], [1], [0, 0, 1, 1], [], []>} : vector<8x32xf32>, vector<32x32xf32>, vector<8x32xf32> -> vector<8x32xf32>
      %c0_17 = arith.constant 0 : index
      %c0_18 = arith.constant 0 : index
      %71 = vector.load %arg5[%c0_17, %c0_18] : memref<1x32xf32, #tpu.memory_space<vmem>>, vector<1x32xf32>
      %72 = vector.broadcast %71 : vector<1x32xf32> to vector<8x32xf32>
      %73 = arith.addf %70, %72 : vector<8x32xf32>
      %74 = math.tanh %73 : vector<8x32xf32>
      %c0_19 = arith.constant 0 : index
      %c0_20 = arith.constant 0 : index
      %75 = vector.load %arg6[%c0_19, %c0_20] : memref<32x32xf32, #tpu.memory_space<vmem>>, vector<32x32xf32>
      %cst_21 = arith.constant dense<0.000000e+00> : vector<8x32xf32>
      %76 = tpu.matmul %74, %75, %cst_21 {dimension_numbers = #tpu.dot_dimension_numbers<[1], [0], [0], [1], [0, 0, 1, 1], [], []>} : vector<8x32xf32>, vector<32x32xf32>, vector<8x32xf32> -> vector<8x32xf32>
      %c0_22 = arith.constant 0 : index
      %c0_23 = arith.constant 0 : index
      %77 = vector.load %arg7[%c0_22, %c0_23] : memref<1x32xf32, #tpu.memory_space<vmem>>, vector<1x32xf32>
      %78 = vector.broadcast %77 : vector<1x32xf32> to vector<8x32xf32>
      %79 = arith.addf %76, %78 : vector<8x32xf32>
      %80 = math.tanh %79 : vector<8x32xf32>
      %c0_24 = arith.constant 0 : index
      %c0_25 = arith.constant 0 : index
      %81 = vector.load %arg8[%c0_24, %c0_25] : memref<32x128xf32, #tpu.memory_space<vmem>>, vector<32x128xf32>
      %cst_26 = arith.constant dense<0.000000e+00> : vector<8x128xf32>
      %82 = tpu.matmul %80, %81, %cst_26 {dimension_numbers = #tpu.dot_dimension_numbers<[1], [0], [0], [1], [0, 0, 1, 1], [], []>} : vector<8x32xf32>, vector<32x128xf32>, vector<8x128xf32> -> vector<8x128xf32>
      %c0_27 = arith.constant 0 : index
      %c0_28 = arith.constant 0 : index
      %83 = vector.load %arg9[%c0_27, %c0_28] : memref<1x128xf32, #tpu.memory_space<vmem>>, vector<1x128xf32>
      %84 = vector.broadcast %83 : vector<1x128xf32> to vector<8x128xf32>
      %85 = arith.addf %82, %84 : vector<8x128xf32>
      %86 = tpu.iota {dimensions = array<i32: 1>} : vector<8x128xi32>
      %c8_i32 = arith.constant 8 : i32
      %87 = vector.broadcast %c8_i32 : i32 to vector<8x128xi32>
      %88 = arith.cmpi slt, %86, %87 : vector<8x128xi32>
      %cst_29 = arith.constant -1.000000e+30 : f32
      %89 = vector.broadcast %cst_29 : f32 to vector<8x128xf32>
      %90 = arith.select %88, %85, %89 : vector<8x128xi1>, vector<8x128xf32>
      %cst_30 = arith.constant dense<0xFF800000> : vector<8xf32>
      %91 = vector.multi_reduction <maximumf>, %90, %cst_30 [1] : vector<8x128xf32> to vector<8xf32>
      %92 = vector.shape_cast %91 : vector<8xf32> to vector<8x1xf32>
      %93 = vector.broadcast %92 : vector<8x1xf32> to vector<8x128xf32>
      %94 = arith.subf %90, %93 : vector<8x128xf32>
      %95 = math.exp %94 : vector<8x128xf32>
      %cst_31 = arith.constant dense<0.000000e+00> : vector<8xf32>
      %96 = vector.multi_reduction <add>, %95, %cst_31 [1] : vector<8x128xf32> to vector<8xf32>
      %97 = vector.shape_cast %96 : vector<8xf32> to vector<8x1xf32>
      %98 = tpu.reciprocal %97 {approx = true} : vector<8x1xf32> -> vector<8x1xf32>
      %99 = vector.broadcast %98 : vector<8x1xf32> to vector<8x128xf32>
      %100 = arith.mulf %95, %99 : vector<8x128xf32>
      %c0_32 = arith.constant 0 : index
      %c0_33 = arith.constant 0 : index
      %101 = vector.load %arg10[%c0_32, %c0_33] : memref<8x128xf32, #tpu.memory_space<vmem>>, vector<8x128xf32>
      tpu.vector_store %arg10[%c0_32, %c0_33], %100 {strides = array<i32>} : memref<8x128xf32, #tpu.memory_space<vmem>>, vector<8x128xf32>,
    } else {
    }
    return
  }
  func.func @transform_0(%arg0: i32, %arg1: i32) -> (i32, i32) {
    %c0_i32 = arith.constant 0 : i32
    %c0_i32_0 = arith.constant 0 : i32
    return %arg0, %c0_i32 : i32, i32
  }
  func.func @transform_1(%arg0: i32, %arg1: i32) -> (i32, i32) {
    %c0_i32 = arith.constant 0 : i32
    %c0_i32_0 = arith.constant 0 : i32
    return %arg1, %c0_i32 : i32, i32
  }
  func.func @transform_2(%arg0: i32, %arg1: i32) -> (i32, i32) {
    %c0_i32 = arith.constant 0 : i32
    %c0_i32_0 = arith.constant 0 : i32
    %c0_i32_1 = arith.constant 0 : i32
    return %c0_i32, %c0_i32_0 : i32, i32
  }
  func.func @transform_3(%arg0: i32, %arg1: i32) -> (i32, i32) {
    %c0_i32 = arith.constant 0 : i32
    %c0_i32_0 = arith.constant 0 : i32
    %c0_i32_1 = arith.constant 0 : i32
    return %c0_i32, %c0_i32_0 : i32, i32
  }
  func.func @transform_4(%arg0: i32, %arg1: i32) -> (i32, i32) {
    %c0_i32 = arith.constant 0 : i32
    %c0_i32_0 = arith.constant 0 : i32
    %c0_i32_1 = arith.constant 0 : i32
    return %c0_i32, %c0_i32_0 : i32, i32
  }
  func.func @transform_5(%arg0: i32, %arg1: i32) -> (i32, i32) {
    %c0_i32 = arith.constant 0 : i32
    %c0_i32_0 = arith.constant 0 : i32
    %c0_i32_1 = arith.constant 0 : i32
    return %c0_i32, %c0_i32_0 : i32, i32
  }
  func.func @transform_6(%arg0: i32, %arg1: i32) -> (i32, i32) {
    %c0_i32 = arith.constant 0 : i32
    %c0_i32_0 = arith.constant 0 : i32
    %c0_i32_1 = arith.constant 0 : i32
    return %c0_i32, %c0_i32_0 : i32, i32
  }
  func.func @transform_7(%arg0: i32, %arg1: i32) -> (i32, i32) {
    %c0_i32 = arith.constant 0 : i32
    %c0_i32_0 = arith.constant 0 : i32
    %c0_i32_1 = arith.constant 0 : i32
    return %c0_i32, %c0_i32_0 : i32, i32
  }
  func.func @transform_8(%arg0: i32, %arg1: i32) -> (i32, i32) {
    %c0_i32 = arith.constant 0 : i32
    %c0_i32_0 = arith.constant 0 : i32
    return %arg0, %c0_i32 : i32, i32
  }
}

</mosaic_0001>

<bundles_post_ra>
// kernel: tpu_custom_call.1
= control target key start
LH: loop header
LB: loop body
LE: loop exit
PB: predicated region body
PF: predicated region fallthrough
CT: control target
= control target key end

     0   :  { %13 = vsyncpa [#allocation4], 0  ;;  %s890_s0 = inlined_call_operand.hbm [shape: s32[8,8], index: 0, kind: input, shape index: {}]   ;;  %s891_s1 = inlined_call_operand.vmem [shape: bf16[64,32], index: 1, kind: input, shape index: {}]   ;;  %s892_s2 = inlined_call_operand.vmem [shape: f32[32,32], index: 2, kind: input, shape index: {}]   ;;  %s893_s3 = inlined_call_operand.vmem [shape: f32[1,32], index: 3, kind: input, shape index: {}]   ;;  %s894_s4 = inlined_call_operand.hbm [shape: f32[32,32], index: 4, kind: input, shape index: {}]   ;;  %s895_s5 = inlined_call_operand.vmem [shape: f32[1,32], index: 5, kind: input, shape index: {}]   ;;  %s896_s6 = inlined_call_operand.vmem [shape: f32[32,128], index: 6, kind: input, shape index: {}]   ;;  %s897_s7 = inlined_call_operand.vmem [shape: f32[1,128], index: 7, kind: input, shape index: {}]   ;;  %s898_s8 = inlined_call_operand.hbm [shape: f32[8,128], index: 8, kind: output, shape index: {}]  }
   0x1   :  { %14 = vsyncpa [#allocation7], 0 }
   0x2   :  { %15 = vsyncpa [#allocation5], 0  ;;  %s704_s27 = smov [#allocation3]   ;;  %s705_s29 = smov [#allocation6]  }
   0x3   :  { %s22_s28 = sshll.u32 %s704_s27, 4  ;;  %s37_s30 = sshll.u32 %s705_s29, 4  ;;  %s23_s28 = int_to_ptr.vmem [resolvable:$true] %s22_s28  ;;  %s765_s30 = int_to_ptr.vmem [resolvable:$true] %s37_s30 }
   0x4   :  { %s632_s11 = scalar_lea.hbm %s890_s0, 128 }
   0x5   :  { %p633_p0 = scmp.ne.s32.totalorder %s890_s0, %s632_s11  ;;  %p636_p1 = scmp.lt.u32.totalorder %s632_s11, %s890_s0 }
   0x7   :  { %p638_p2 = pnand %p636_p1, %p633_p0 }
   0x9   :  { %641 = shalt.err (!%p638_p2)
}
   0xa   :  { %s642_s16 = scalar_lea.vmem %s23_s28, 128  ;;  %p647_p4 = scmp.lt.s32.totalorder %s23_s28, %s23_s28 }
   0xb   :  { %p643_p3 = scmp.ne.s32.totalorder %s23_s28, %s642_s16  ;;  %p648_p5 = scmp.lt.s32.totalorder %s642_s16, %s642_s16 }
   0xd   :  { %p649_p6 = por %p648_p5, %p647_p4 }
   0xf   :  { %p650_p7 = pnand %p649_p6, %p643_p3 }
  0x11   :  { %653 = shalt.err (!%p650_p7)
}
  0x12   :  { %25 = dma.hbm_to_vmem [thread:$0]  %s890_s0, 128, %s23_s28, [#allocation4]  }
  0x13   :  { %s654_s21 = scalar_lea.hbm %s894_s4, 512 }
  0x14   :  { %p655_p8 = scmp.ne.s32.totalorder %s894_s4, %s654_s21  ;;  %p658_p9 = scmp.lt.u32.totalorder %s654_s21, %s894_s4 }
  0x16   :  { %p660_p10 = pnand %p658_p9, %p655_p8 }
  0x18   :  { %663 = shalt.err (!%p660_p10)
}
  0x19   :  { %s664_s26 = scalar_lea.vmem %s765_s30, 512  ;;  %p669_p12 = scmp.lt.s32.totalorder %s765_s30, %s765_s30 }
  0x1a   :  { %p665_p11 = scmp.ne.s32.totalorder %s765_s30, %s664_s26  ;;  %p670_p13 = scmp.lt.s32.totalorder %s664_s26, %s664_s26 }
  0x1c   :  { %p671_p0 = por %p670_p13, %p669_p12 }
  0x1e   :  { %p672_p1 = pnand %p671_p0, %p665_p11 }
  0x20   :  { %675 = shalt.err (!%p672_p1)
}
  0x21   :  { %s706_s0 = smov 128   ;;  %s707_s27 = smov 8  }
  0x22   :  { %43 = dma.hbm_to_vmem [thread:$0]  %s894_s4, 512, %s765_s30, [#allocation7], %s706_s0, %s706_s0, %s707_s27  }
  0x23   :  { %698 = dma.done.wait [#allocation4], 128  }
  0x24   :  { %699 = vsyncadd [#allocation4], 4294967168 }
  0x25   :  { %700 = dma.done.wait [#allocation7], 512  }
  0x26   :  { %701 = vsyncadd [#allocation7], 4294966784  ;;  %v708_v0 = vmov 2   ;;  %v709_v1 = vmov 0   ;;  %v710_v2 = vmov 0.0   ;;  %v63_v3 = vld [vmem:[#allocation3] sm:$0xff]  ;;  %v64_v14 = vlaneseq }
  0x27   :  { %613 = vset.pattern.permute.xlu1 %v708_v0  ;;  %611 = vset.pattern.permute.xlu0 %v709_v1  ;;  %v711_v4 = vmov 3   ;;  %v712_v5 = vmov 1   ;;  %v713_v6 = vmov 4   ;;  %v714_v7 = vmov 5   ;;  %v620_v8 = vld [vmem:[%s891_s1] sm:$0xff]   ;;  %v621_v9 = vld [vmem:[%s891_s1 + $0x8] sm:$0xff]  }
  0x28   :  { %532 = vmatprep.subr.bf16.mxu0 %v710_v2  ;;  %84 = vperm.xlu1 %613, %v63_v3   ;;  %v715_v10 = vmov 6   ;;  %v716_v11 = vmov 7   ;;  %v622_v12 = vld [vmem:[%s891_s1 + $0x10] sm:$0xff]   ;;  %v623_v13 = vld [vmem:[%s891_s1 + $0x18] sm:$0xff]   ;;  %vm717_vm0 = vmmov 0   ;;  %vm61_vm1 = vcmask 261120  }
  0x29   :  { %70 = vperm.xlu0 %611, %v63_v3   ;;  %533 = vmatpush3.bf16.msra.mxu0 %v620_v8  ;;  %62 = vst.msk [vmem:[#allocation2] sm:$0xff] %vm61_vm1, %v710_v2  ;;  %v818_v17 = vand.u32 127, %v64_v14  ;;  %vm159_vm10 = vcmask 523264   ;;  %v211_v40 = vld [vmem:[%s892_s2] sm:$0xff]  ;;  %v212_v41 = vld [vmem:[%s892_s2 + $0x8] sm:$0xff]  ;;  %v213_v42 = vld [vmem:[%s892_s2 + $0x10] sm:$0xff] }
  0x2a   :  { %534 = vmatprep.subr.bf16.mxu0 %v710_v2  ;;  %540 = vmatprep.mubr.msk.bf16.mxu0 %vm717_vm0, %v710_v2  ;;  %v718_v43 = vmov 0.0|0.0   ;;  %v578_v44 = vpack.c.bf16 %v212_v41, %v211_v40  ;;  %v214_v45 = vld [vmem:[%s892_s2 + $0x18] sm:$0xff]  ;;  %v296_v55 = vld [vmem:[#allocation6] sm:$0xff]  ;;  %v298_v57 = vld [vmem:[#allocation6 + $0x10] sm:$0xff] }
  0x2b   :  { %552 = vmatprep.mubr.msk.f32.mxu1 %vm717_vm0, %v710_v2  ;;  %577 = vmatprep.subr.bf16.mxu1 %v718_v43  ;;  %v581_v46 = vpack.c.bf16 %v214_v45, %v213_v42  ;;  %v297_v56 = vld [vmem:[#allocation6 + $0x8] sm:$0xff]  ;;  %v299_v59 = vld [vmem:[#allocation6 + $0x18] sm:$0xff]  ;;  %v506_v61 = vld [vmem:[%s893_s3] ss:$0 sm:$0xff]  ;;  %vm465_vm11 = vcmp.lt.s32.totalorder %v818_v17, 8 }
  0x2c   :  { %614 = vset.pattern.permute.xlu1 %v711_v4  ;;  %579 = vmatpush3.bf16.msra.mxu1 %v578_v44  ;;  %v584_v58 = vpack.c.bf16 %v297_v56, %v296_v55  ;;  %v587_v60 = vpack.c.bf16 %v299_v59, %v298_v57  ;;  %v383_v4 = vld [vmem:[%s896_s6 + $0x10] sm:$0xff]  ;;  %v508_v8 = vld [vmem:[%s895_s5] ss:$0 sm:$0xff]  ;;  %s719_s5 = smov [#allocation8]  }
  0x2d   :  { %612 = vset.pattern.permute.xlu0 %v712_v5  ;;  %91 = vperm.xlu1 %614, %v63_v3  }
  0x2e   :  { %77 = vperm.xlu0 %612, %v63_v3   ;;  %535 = vmatpush3.bf16.msra.mxu0 %v621_v9 }
  0x2f   :  { %536 = vmatprep.subr.bf16.mxu0 %v710_v2  ;;  %580 = vmatprep.subr.bf16.mxu1 %v718_v43 }
  0x30   :  { %582 = vmatpush3.bf16.msra.mxu1 %v581_v46  ;;  %v134_v47 = vld [vmem:[#allocation2] sm:$0xff] }
  0x31   :  { %615 = vset.pattern.permute.xlu1 %v713_v6  ;;  %583 = vmatprep.subr.bf16.mxu1 %v718_v43  ;;  %v384_v6 = vld [vmem:[%s896_s6 + $0x18] sm:$0xff] }
  0x32   :  { %616 = vset.pattern.permute.xlu0 %v714_v7  ;;  %98 = vperm.xlu1 %615, %v63_v3   ;;  %v593_v7 = vpack.c.bf16 %v384_v6, %v383_v4 }
  0x33   :  { %105 = vperm.xlu0 %616, %v63_v3   ;;  %537 = vmatpush3.bf16.msra.mxu0 %v622_v12 }
  0x34   :  { %538 = vmatprep.subr.bf16.mxu0 %v710_v2 }
  0x36   :  { %617 = vset.pattern.permute.xlu1 %v715_v10 }
  0x37   :  { %619 = vset.pattern.permute.xlu0 %v716_v11  ;;  %112 = vperm.xlu1 %617, %v63_v3  }
  0x38   :  { %539 = vmatpush3.bf16.msra.mxu0 %v623_v13  ;;  %v510_v13 = vld [vmem:[%s897_s7] ss:$0 sm:$0xff] }
  0x39   :  { %589 = vmatprep.subr.bf16.mxu0 %v718_v43 }
  0x3b   :  { %618 = vset.pattern.permute.xlu1 %v716_v11 }
  0x3c   :  { %119 = vperm.xlu1 %618, %v63_v3   ;;  %v382_v3 = vld [vmem:[%s896_s6 + $0x8] sm:$0xff] }
  0xa7   :  { %v85_v15 = vpop.permute.xlu1 %84 }
  0xa8   :  { %v71_v16 = vpop.permute.xlu0 %70  ;;  %vm86_vm3 = vcmp.eq.s32.totalorder %v818_v17, %v85_v15 }
  0xa9   :  { %vm72_vm2 = vcmp.eq.s32.totalorder %v818_v17, %v71_v16  ;;  %v495_v23 = vsel %vm86_vm3, 1.0, %v710_v2 }
  0xaa   :  { %v493_v20 = vsel %vm72_vm2, 1.0, %v710_v2 }
  0xac   :  { %v92_v18 = vpop.permute.xlu1 %91 }
  0xad   :  { %v78_v19 = vpop.permute.xlu0 %77  ;;  %vm93_vm5 = vcmp.eq.s32.totalorder %v818_v17, %v92_v18 }
  0xae   :  { %vm79_vm4 = vcmp.eq.s32.totalorder %v818_v17, %v78_v19  ;;  %v496_v27 = vsel %vm93_vm5, 1.0, %v710_v2 }
  0xaf   :  { %v494_v21 = vsel %vm79_vm4, 1.0, %v710_v2 }
  0xb0   :  { %v82_v22 = vadd.f32 %v494_v21, %v493_v20 }
  0xb1   :  { %v99_v25 = vpop.permute.xlu1 %98 }
  0xb2   :  { %v89_v24 = vadd.f32 %v495_v23, %v82_v22  ;;  %v106_v26 = vpop.permute.xlu0 %105  ;;  %vm100_vm6 = vcmp.eq.s32.totalorder %v818_v17, %v99_v25 }
  0xb3   :  { %vm107_vm7 = vcmp.eq.s32.totalorder %v818_v17, %v106_v26  ;;  %v497_v29 = vsel %vm100_vm6, 1.0, %v710_v2 }
  0xb4   :  { %v96_v28 = vadd.f32 %v496_v27, %v89_v24  ;;  %v498_v31 = vsel %vm107_vm7, 1.0, %v710_v2 }
  0xb6   :  { %v103_v30 = vadd.f32 %v497_v29, %v96_v28  ;;  %v113_v32 = vpop.permute.xlu1 %112 }
  0xb7   :  { %vm114_vm8 = vcmp.eq.s32.totalorder %v818_v17, %v113_v32 }
  0xb8   :  { %v110_v33 = vadd.f32 %v498_v31, %v103_v30  ;;  %v499_v34 = vsel %vm114_vm8, 1.0, %v710_v2 }
  0xba   :  { %v117_v36 = vadd.f32 %v499_v34, %v110_v33 }
  0xbb   :  { %v120_v35 = vpop.permute.xlu1 %119 }
  0xbc   :  { %vm121_vm9 = vcmp.eq.s32.totalorder %v818_v17, %v120_v35 }
  0xbd   :  { %v500_v37 = vsel %vm121_vm9, 1.0, %v710_v2 }
  0xbe   :  { %v124_v38 = vadd.f32 %v500_v37, %v117_v36 }
  0xc0   :  { %v133_v39 = vpack.c.bf16 %v124_v38, %v124_v38 }
  0xc2   :  { %541 = vmatmul.mubr.msk.bf16.vlgmr.msra.gmra.mrb[0].mxu0 %vm159_vm10, %v133_v39 }
  0xc3   :  { %574 = vmatprep.mubr.msk.f32.mxu0 %vm717_vm0, %v710_v2 }
 0x195   :  { %v197_v48 = vpop.f32.mrb[0].mxu0 }
 0x196   :  { %v203_v49 = vadd.f32 %v197_v48, %v134_v47  ;;  %v542_v50 = vpop.f32.mrb[1].mxu0 }
 0x197   :  { %v200_v51 = vpop.f32.mrb[2].mxu0 }
 0x198   :  { %205 = vst.msk [vmem:[#allocation2] sm:$0xff] %vm61_vm1, %v203_v49  ;;  %v543_v52 = vpop.f32.mrb[3].mxu0 }
 0x19f   :  { %v209_v53 = vld [vmem:[#allocation2] sm:$0xff] }
 0x1a0   :  { %v210_v54 = vmul.f32 0.125, %v209_v53 }
 0x1a2   :  { %553 = vmatmul.mubr.msk.f32.vlgmr.msra.gmra.mrb[0].mxu1 %vm61_vm1, %v210_v54 }
 0x1a3   :  { %563 = vmatprep.mubr.msk.f32.mxu1 %vm717_vm0, %v710_v2  ;;  %585 = vmatpush3.bf16.msra.mxu1 %v584_v58  ;;  %v381_v2 = vld [vmem:[%s896_s6] sm:$0xff]  ;;  %s483_s6 = sshll.u32 %s719_s5, 4  ;;  %s484_s6 = int_to_ptr.vmem [resolvable:$true] %s483_s6 }
 0x1a4   :  { %586 = vmatprep.subr.bf16.mxu1 %v718_v43  ;;  %v590_v5 = vpack.c.bf16 %v382_v3, %v381_v2  ;;  %s676_s7 = scalar_lea.vmem %s484_s6, 128  ;;  %p681_p3 = scmp.lt.s32.totalorder %s484_s6, %s484_s6 }
 0x1a5   :  { %p677_p2 = scmp.ne.s32.totalorder %s484_s6, %s676_s7  ;;  %p682_p4 = scmp.lt.s32.totalorder %s676_s7, %s676_s7 }
 0x1a6   :  { %591 = vmatpush3.bf16.msra.mxu0 %v590_v5 }
 0x1a7   :  { %588 = vmatpush3.bf16.msra.mxu1 %v587_v60  ;;  %592 = vmatprep.subr.bf16.mxu0 %v718_v43  ;;  %p683_p5 = por %p682_p4, %p681_p3 }
 0x1a9   :  { %p684_p6 = pnand %p683_p5, %p677_p2 }
 0x1aa   :  { %594 = vmatpush3.bf16.msra.mxu0 %v593_v7 }
 0x275   :  { %v291_v62 = vpop.f32.mrb[0].mxu1 }
 0x276   :  { %v292_v63 = vadd.f32 %v506_v61, %v291_v62  ;;  %v554_v0 = vpop.f32.mrb[1].mxu1 }
 0x278   :  { %624 = vtanh.f32 %v292_v63 }
 0x282   :  { %v625_v1 = vpop.eup %624 }
 0x283   :  { %564 = vmatmul.mubr.msk.f32.vlgmr.msra.gmra.mrb[2].mxu1 %vm61_vm1, %v625_v1 }
 0x356   :  { %v376_v9 = vpop.f32.mrb[2].mxu1 }
 0x357   :  { %v377_v10 = vadd.f32 %v508_v8, %v376_v9  ;;  %v565_v11 = vpop.f32.mrb[3].mxu1 }
 0x359   :  { %626 = vtanh.f32 %v377_v10 }
 0x363   :  { %v627_v12 = vpop.eup %626 }
 0x364   :  { %575 = vmatmul.mubr.msk.f32.vlgmr.msra.gmra.mrb[4].mxu0 %vm61_vm1, %v627_v12 }
 0x437   :  { %v461_v14 = vpop.f32.mrb[4].mxu0 }
 0x438   :  { %v462_v15 = vadd.f32 %v510_v13, %v461_v14  ;;  %v576_v16 = vpop.f32.mrb[5].mxu0 }
 0x43a   :  { %v466_v18 = vsel %vm465_vm11, %v462_v15, -1e+30 }
 0x43b   :  { %467 = vmax.xlane.f32.xlu0 %v466_v18 }
 0x4c8   :  { %v468_v19 = vpop.xlane.xlu0 %467 }
 0x4c9   :  { %v469_v20 = vsub.f32 %v466_v18, %v468_v19 }
 0x4cb   :  { %v470_v21 = vmul.f32 1.442695, %v469_v20 }
 0x4cd   :  { %628 = vpow2.f32 %v470_v21 }
 0x4d7   :  { %v629_v22 = vpop.eup %628 }
 0x4d8   :  { %472 = vadd.xlane.f32.xlu1 %v629_v22 }
 0x565   :  { %v473_v23 = vpop.xlane.xlu1 %472 }
 0x566   :  { %630 = vrcp.f32 %v473_v23 }
 0x570   :  { %v631_v24 = vpop.eup %630 }
 0x571   :  { %v475_v25 = vmul.f32 %v631_v24, %v629_v22 }
 0x573   :  { %476 = vst [vmem:[#allocation8] sm:$0xff] %v475_v25 }
 0x574   :  { %687 = shalt.err (!%p684_p6)
}
 0x575   :  { %s688_s12 = scalar_lea.hbm %s898_s8, 128 }
 0x576   :  { %p689_p7 = scmp.ne.s32.totalorder %s898_s8, %s688_s12  ;;  %p692_p8 = scmp.lt.u32.totalorder %s688_s12, %s898_s8 }
 0x578   :  { %p694_p9 = pnand %p692_p8, %p689_p7 }
 0x57a   :  { %697 = shalt.err (!%p694_p9)
}
 0x57b   :  { %486 = dma.vmem_to_hbm [thread:$0]  %s484_s6, 128, %s898_s8, [#allocation5]  }
 0x57c   :  { %702 = dma.done.wait [#allocation5], 128  }
 0x57d   :  { %703 = vsyncadd [#allocation5], 4294967168 }
 0x57e   :  { %490 = vsyncpa [#allocation4], 1 }
 0x57f   :  { %491 = vsyncpa [#allocation7], 1 }
 0x580   :  { %492 = vsyncpa [#allocation5], 1 }

</bundles_post_ra>
